<compile_context>
chip_gen: v7x
topology: tpu7x:2x2x1
jax: 0.10.0
libtpu: 0.0.40
codegen_flags: <defaults>
</compile_context>

<pallas_src>
import functools
import math

import jax
import jax.numpy as jnp
import numpy as np
from jax.experimental import pallas as pl
from jax.experimental.pallas import tpu as pltpu


def aff_kernel(x_ref, y_ref, prm_ref, lnp_ref, rmat_ref, bmat_ref, out_ref,
               *, eps, inv_f):
    """One (batch, row-tile) block.

    x_ref/y_ref/out_ref : (1, TR, L) VMEM, L = fold*F (lane-dense, multiple of 128)
    prm_ref  : (TR, 5) VMEM per-row [w3, b3, w4, b4 + global_const, prelu_a]
    lnp_ref  : (2, L)  VMEM [tile(gamma_l, fold), tile(beta_l, fold)]
    rmat_ref : (L, foldp) VMEM 0/1 segment-membership (reduce) matrix
    bmat_ref : (foldp, L) VMEM 0/1 broadcast-back matrix (= rmat.T)
    """
    x = x_ref[0].astype(jnp.float32)            # (TR, L)
    y = y_ref[0].astype(jnp.float32)

    w3 = prm_ref[:, 0:1]                        # (TR, 1) per-row (== per-channel)
    b3 = prm_ref[:, 1:2]
    w4 = prm_ref[:, 2:3]
    c4 = prm_ref[:, 3:4]                        # b4 + collapsed global branch
    a_l = prm_ref[:, 4:5]                       # PReLU slope

    xs = x + y
    l = xs * w3 + b3                            # depthwise 1x1 conv (local branch)

    rmat = rmat_ref[...]
    bmat = bmat_ref[...]

    # ---- LayerNorm(F, eps=C) per F-sized lane segment ----
    # Segment sums via 0/1 matmuls (MXU slot), scaled by 1/F on the VPU, then
    # broadcast back with the transposed 0/1 matrix.  Two-pass variance.
    m1 = jnp.dot(jnp.dot(l, rmat, preferred_element_type=jnp.float32) * inv_f,
                 bmat, preferred_element_type=jnp.float32)
    cen = l - m1
    var = jnp.dot(jnp.dot(cen * cen, rmat, preferred_element_type=jnp.float32) * inv_f,
                  bmat, preferred_element_type=jnp.float32)
    inv = jax.lax.rsqrt(var + eps)              # EUP
    ln = cen * (lnp_ref[0:1, :] * inv) + lnp_ref[1:2, :]

    pr = jnp.where(ln >= 0, ln, a_l * ln)       # PReLU
    w = jax.nn.sigmoid(pr * w4 + c4)            # conv4 + collapsed global, sigmoid
    out_ref[0] = (y + w * (x - y)).astype(out_ref.dtype)   # x*w + (1-w)*y


def _vmem_limit_bytes():
    """Generation-aware scoped-VMEM request: 96 MiB on 128-MiB-VMEM parts
    (v4/v5e/v6e), conservative 48 MiB otherwise (v7x-class has 64 MiB/core)."""
    kind = ""
    try:
        kind = jax.devices()[0].device_kind.lower()
    except Exception:
        pass
    big_vmem = any(tag in kind for tag in ("v4", "v5", "v6"))
    return (96 << 20) if big_vmem else (48 << 20)


def _pick_row_tile(n_rows, L, in_itemsize, foldp, vmem_limit):
    """Largest row tile (multiple of 8, or the full row count) fitting the budget.

    Per-row budget: 3 blocked arrays (x, y, out) double-buffered at the I/O
    dtype, ~6 f32 in-kernel temporaries, and the (TR,5)->(TR,128)-padded param
    tile (double-buffered). Grid-invariant constants are subtracted up front.
    """
    lane_pad = ((foldp + 127) // 128) * 128
    sub_pad = ((foldp + 7) // 8) * 8
    const_bytes = 2 * 4 * (L * lane_pad + sub_pad * L + 8 * L)   # rmat, bmat, lnp (x2 bufs)
    budget = int(vmem_limit * 0.7) - const_bytes
    per_row = 3 * 2 * L * in_itemsize + 6 * L * 4 + 2 * 128 * 4
    tr = max(8, budget // per_row)
    tr = (tr // 8) * 8
    if tr >= n_rows:
        return n_rows
    return tr


def aff_forward(x, y, params):
    """AFF forward: out = x*w + (1-w)*y with w = sigmoid(global + local) (MS_CAM)."""
    assert x.shape == y.shape and x.ndim == 4
    B, C, T, F = x.shape
    f32 = lambda v: jnp.asarray(v, jnp.float32)

    # ---- lane folding: make the trailing (lane) dim a multiple of 128 ----
    fold = 128 // math.gcd(F, 128)
    L = fold * F
    Tp = ((T + fold - 1) // fold) * fold
    if Tp != T:                      # pad T instead of falling back to narrow lanes
        pad = ((0, 0), (0, 0), (0, Tp - T), (0, 0))
        x = jnp.pad(x, pad)
        y = jnp.pad(y, pad)
    R = Tp // fold
    N = C * R                        # channels folded into the row axis

    xr = x.reshape(B, N, L)          # contiguous reshape: free
    yr = y.reshape(B, N, L)

    # ---- collapse the degenerate global branch into a per-channel constant ----
    # LayerNorm over a size-1 axis is identically its bias beta_g, hence
    # layer_global(x+y)[b,c,t,:] == PReLU(beta_g) * w2[c] + b2[c].
    beta_g = f32(params["beta_g"])
    g_act = jnp.where(beta_g >= 0, beta_g, f32(params["a_g"]) * beta_g)
    g_const = g_act * f32(params["w2"]) + f32(params["b2"])                  # (C,)

    # per-row conv / PReLU parameters: [w3, b3, w4, b4 + g_const, prelu_a]
    prm_c = jnp.stack([f32(params["w3"]), f32(params["b3"]), f32(params["w4"]),
                       f32(params["b4"]) + g_const,
                       jnp.broadcast_to(f32(params["a_l"]), (C,))], axis=1)  # (C, 5)
    prm_rows = jnp.repeat(prm_c, R, axis=0)                                  # (N, 5)

    # LayerNorm affine params, tiled `fold` times along the folded lane axis.
    lnp = jnp.stack([jnp.tile(f32(params["gamma_l"]), fold),
                     jnp.tile(f32(params["beta_l"]), fold)], axis=0)         # (2, L)

    # Factored 0/1 segment matrices (exact in bf16): reduce (L,foldp), bcast (foldp,L).
    foldp = max(fold, 8)
    seg = np.arange(L) // F
    rmat_np = (seg[:, None] == np.arange(foldp)[None, :]).astype(np.float32)
    rmat = jnp.asarray(rmat_np)                                              # (L, foldp)
    bmat = jnp.asarray(rmat_np.T)                                            # (foldp, L)

    vmem_limit = _vmem_limit_bytes()
    TR = _pick_row_tile(N, L, x.dtype.itemsize, foldp, vmem_limit)
    grid = (B, pl.cdiv(N, TR))

    n_elem = B * N * L
    cost = pl.CostEstimate(
        flops=int(n_elem * (20 + 4 * foldp)),
        transcendentals=int(3 * n_elem),
        bytes_accessed=int(3 * n_elem * x.dtype.itemsize))

    kernel = functools.partial(aff_kernel, eps=float(C), inv_f=1.0 / float(F))

    out = pl.pallas_call(
        kernel,
        out_shape=jax.ShapeDtypeStruct((B, N, L), x.dtype),
        grid=grid,
        in_specs=[
            pl.BlockSpec((1, TR, L), lambda b, t: (b, t, 0)),     # x
            pl.BlockSpec((1, TR, L), lambda b, t: (b, t, 0)),     # y
            pl.BlockSpec((TR, 5), lambda b, t: (t, 0)),           # per-row params
            pl.BlockSpec((2, L), lambda b, t: (0, 0)),            # gamma/beta (tiled)
            pl.BlockSpec((L, foldp), lambda b, t: (0, 0)),        # segment reduce 0/1
            pl.BlockSpec((foldp, L), lambda b, t: (0, 0)),        # segment bcast 0/1
        ],
        out_specs=pl.BlockSpec((1, TR, L), lambda b, t: (b, t, 0)),
        compiler_params=pltpu.CompilerParams(
            dimension_semantics=("parallel", "parallel"),
            vmem_limit_bytes=vmem_limit),
        cost_estimate=cost,
    )(xr, yr, prm_rows, lnp, rmat, bmat)

    out = out.reshape(B, C, Tp, F)
    if Tp != T:
        out = out[:, :, :T, :]
    return out


def aff_reference(x, y, p):
    """Pure-JAX reference faithfully mirroring the PyTorch forward (no collapsing)."""
    C = x.shape[1]
    eps = float(C)
    cw = lambda v: v[None, :, None, None]
    xs = x + y
    # global branch
    g = jnp.mean(xs, axis=-1, keepdims=True)
    g = g * cw(p["w1"]) + cw(p["b1"])
    gm = jnp.mean(g, axis=-1, keepdims=True)
    gv = jnp.mean((g - gm) ** 2, axis=-1, keepdims=True)
    g = (g - gm) / jnp.sqrt(gv + eps) * p["gamma_g"] + p["beta_g"]
    g = jnp.where(g >= 0, g, p["a_g"] * g)
    g = g * cw(p["w2"]) + cw(p["b2"])
    # local branch
    l = xs * cw(p["w3"]) + cw(p["b3"])
    lm = jnp.mean(l, axis=-1, keepdims=True)
    lv = jnp.mean((l - lm) ** 2, axis=-1, keepdims=True)
    l = (l - lm) / jnp.sqrt(lv + eps) * p["gamma_l"] + p["beta_l"]
    l = jnp.where(l >= 0, l, p["a_l"] * l)
    l = l * cw(p["w4"]) + cw(p["b4"])
    w = jax.nn.sigmoid(g + l)
    return x * w + (1.0 - w) * y


def _make_params(key, C, F):
    ks = jax.random.split(key, 10)
    return {
        # layer_global: conv1 -> LN(1, eps=C) -> PReLU -> conv2
        "w1": jax.random.normal(ks[0], (C,)) * 0.5,
        "b1": jax.random.normal(ks[1], (C,)) * 0.1,
        "w2": jax.random.normal(ks[2], (C,)) * 0.5,
        "b2": jax.random.normal(ks[3], (C,)) * 0.1,
        "gamma_g": jnp.float32(1.1),
        "beta_g": jnp.float32(0.05),
        "a_g": jnp.float32(0.25),
        # layer_local: conv3 -> LN(F, eps=C) -> PReLU -> conv4
        "w3": jax.random.normal(ks[4], (C,)) * 0.5,
        "b3": jax.random.normal(ks[5], (C,)) * 0.1,
        "w4": jax.random.normal(ks[6], (C,)) * 0.5,
        "b4": jax.random.normal(ks[7], (C,)) * 0.1,
        "gamma_l": 1.0 + 0.1 * jax.random.normal(ks[8], (F,)),
        "beta_l": 0.1 * jax.random.normal(ks[9], (F,)),
        "a_l": jnp.float32(0.25),
    }


if __name__ == "__main__":
    key = jax.random.PRNGKey(0)
    k0, k1, k2, k3 = jax.random.split(key, 4)

    # Main check: B,C,T,F consistent with the module (folds to a 128-wide lane dim).
    B, C, T, F = 2, 4, 16, 16
    x = jax.random.normal(k0, (B, C, T, F), dtype=jnp.float32)
    y = jax.random.normal(k1, (B, C, T, F), dtype=jnp.float32)
    params = _make_params(k2, C, F)

    out = jax.block_until_ready(aff_forward(x, y, params))
    ref = aff_reference(x, y, params)
    # Segment stats go through the MXU at default precision (worst case: bf16
    # operand cast); two-pass variance keeps end-to-end error ~1e-4.
    np.testing.assert_allclose(np.asarray(out), np.asarray(ref), rtol=1e-3, atol=1e-3)

    # Secondary check: T not a multiple of the lane fold and row count < 8
    # (exercises the T-padding path and a full-extent, non-multiple-of-8 row tile).
    B2, C2, T2, F2 = 1, 3, 12, 16
    x2 = jax.random.normal(k3, (B2, C2, T2, F2), dtype=jnp.float32)
    y2 = jax.random.normal(jax.random.fold_in(k3, 1), (B2, C2, T2, F2), dtype=jnp.float32)
    params2 = _make_params(jax.random.fold_in(k2, 7), C2, F2)
    out2 = jax.block_until_ready(aff_forward(x2, y2, params2))
    ref2 = aff_reference(x2, y2, params2)
    np.testing.assert_allclose(np.asarray(out2), np.asarray(ref2), rtol=1e-3, atol=1e-3)

    print("KERNEL_OK")
</pallas_src>

<mosaic_0001>
module attributes {stable_mosaic.version = 11 : i64} {
  func.func @aff_kernel(%arg0: i32, %arg1: i32, %arg2: memref<1x8x128xf32, #tpu.memory_space<vmem>>, %arg3: memref<1x8x128xf32, #tpu.memory_space<vmem>>, %arg4: memref<8x5xf32, #tpu.memory_space<vmem>>, %arg5: memref<2x128xf32, #tpu.memory_space<vmem>>, %arg6: memref<128x8xf32, #tpu.memory_space<vmem>>, %arg7: memref<8x128xf32, #tpu.memory_space<vmem>>, %arg8: memref<1x8x128xf32, #tpu.memory_space<vmem>>) attributes {dimension_semantics = [#tpu.dimension_semantics<parallel>, #tpu.dimension_semantics<parallel>], iteration_bounds = array<i64: 2, 1>, scalar_prefetch = 0 : i64, scratch_operands = 0 : i64, tpu.core_type = #tpu.core_type<tc>, window_params = [{transform_indices = @transform_0, window_bounds = array<i64: 1, 8, 128>}, {transform_indices = @transform_1, window_bounds = array<i64: 1, 8, 128>}, {transform_indices = @transform_2, window_bounds = array<i64: 8, 5>}, {pipeline_mode = #tpu.pipeline_mode<synchronous>, transform_indices = @transform_3, window_bounds = array<i64: 2, 128>}, {pipeline_mode = #tpu.pipeline_mode<synchronous>, transform_indices = @transform_4, window_bounds = array<i64: 128, 8>}, {pipeline_mode = #tpu.pipeline_mode<synchronous>, transform_indices = @transform_5, window_bounds = array<i64: 8, 128>}, {transform_indices = @transform_6, window_bounds = array<i64: 1, 8, 128>}]} {
    %c0 = arith.constant 0 : index
    %c0_0 = arith.constant 0 : index
    %c0_1 = arith.constant 0 : index
    %0 = vector.load %arg2[%c0, %c0_0, %c0_1] : memref<1x8x128xf32, #tpu.memory_space<vmem>>, vector<1x8x128xf32>
    %1 = vector.shape_cast %0 : vector<1x8x128xf32> to vector<8x128xf32>
    %c0_2 = arith.constant 0 : index
    %c0_3 = arith.constant 0 : index
    %c0_4 = arith.constant 0 : index
    %2 = vector.load %arg3[%c0_2, %c0_3, %c0_4] : memref<1x8x128xf32, #tpu.memory_space<vmem>>, vector<1x8x128xf32>
    %3 = vector.shape_cast %2 : vector<1x8x128xf32> to vector<8x128xf32>
    %c0_5 = arith.constant 0 : index
    %c0_6 = arith.constant 0 : index
    %4 = vector.load %arg4[%c0_5, %c0_6] : memref<8x5xf32, #tpu.memory_space<vmem>>, vector<8x1xf32>
    %c0_7 = arith.constant 0 : index
    %c1 = arith.constant 1 : index
    %5 = vector.load %arg4[%c0_7, %c1] : memref<8x5xf32, #tpu.memory_space<vmem>>, vector<8x1xf32>
    %c0_8 = arith.constant 0 : index
    %c2 = arith.constant 2 : index
    %6 = vector.load %arg4[%c0_8, %c2] : memref<8x5xf32, #tpu.memory_space<vmem>>, vector<8x1xf32>
    %c0_9 = arith.constant 0 : index
    %c3 = arith.constant 3 : index
    %7 = vector.load %arg4[%c0_9, %c3] : memref<8x5xf32, #tpu.memory_space<vmem>>, vector<8x1xf32>
    %c0_10 = arith.constant 0 : index
    %c4 = arith.constant 4 : index
    %8 = vector.load %arg4[%c0_10, %c4] : memref<8x5xf32, #tpu.memory_space<vmem>>, vector<8x1xf32>
    %9 = arith.addf %1, %3 : vector<8x128xf32>
    %10 = vector.broadcast %4 : vector<8x1xf32> to vector<8x128xf32>
    %11 = arith.mulf %9, %10 : vector<8x128xf32>
    %12 = vector.broadcast %5 : vector<8x1xf32> to vector<8x128xf32>
    %13 = arith.addf %11, %12 : vector<8x128xf32>
    %c0_11 = arith.constant 0 : index
    %c0_12 = arith.constant 0 : index
    %14 = vector.load %arg6[%c0_11, %c0_12] : memref<128x8xf32, #tpu.memory_space<vmem>>, vector<128x8xf32>
    %c0_13 = arith.constant 0 : index
    %c0_14 = arith.constant 0 : index
    %15 = vector.load %arg7[%c0_13, %c0_14] : memref<8x128xf32, #tpu.memory_space<vmem>>, vector<8x128xf32>
    %cst = arith.constant dense<0.000000e+00> : vector<8x8xf32>
    %16 = tpu.matmul %13, %14, %cst {dimension_numbers = #tpu.dot_dimension_numbers<[1], [0], [0], [1], [0, 0, 1, 1], [], []>} : vector<8x128xf32>, vector<128x8xf32>, vector<8x8xf32> -> vector<8x8xf32>
    %cst_15 = arith.constant 6.250000e-02 : f32
    %17 = vector.broadcast %cst_15 : f32 to vector<8x8xf32>
    %18 = arith.mulf %16, %17 : vector<8x8xf32>
    %cst_16 = arith.constant dense<0.000000e+00> : vector<8x128xf32>
    %19 = tpu.matmul %18, %15, %cst_16 {dimension_numbers = #tpu.dot_dimension_numbers<[1], [0], [0], [1], [0, 0, 1, 1], [], []>} : vector<8x8xf32>, vector<8x128xf32>, vector<8x128xf32> -> vector<8x128xf32>
    %20 = arith.subf %13, %19 : vector<8x128xf32>
    %21 = arith.mulf %20, %20 : vector<8x128xf32>
    %cst_17 = arith.constant dense<0.000000e+00> : vector<8x8xf32>
    %22 = tpu.matmul %21, %14, %cst_17 {dimension_numbers = #tpu.dot_dimension_numbers<[1], [0], [0], [1], [0, 0, 1, 1], [], []>} : vector<8x128xf32>, vector<128x8xf32>, vector<8x8xf32> -> vector<8x8xf32>
    %cst_18 = arith.constant 6.250000e-02 : f32
    %23 = vector.broadcast %cst_18 : f32 to vector<8x8xf32>
    %24 = arith.mulf %22, %23 : vector<8x8xf32>
    %cst_19 = arith.constant dense<0.000000e+00> : vector<8x128xf32>
    %25 = tpu.matmul %24, %15, %cst_19 {dimension_numbers = #tpu.dot_dimension_numbers<[1], [0], [0], [1], [0, 0, 1, 1], [], []>} : vector<8x8xf32>, vector<8x128xf32>, vector<8x128xf32> -> vector<8x128xf32>
    %cst_20 = arith.constant 4.000000e+00 : f32
    %26 = vector.broadcast %cst_20 : f32 to vector<8x128xf32>
    %27 = arith.addf %25, %26 : vector<8x128xf32>
    %28 = math.rsqrt %27 : vector<8x128xf32>
    %c0_21 = arith.constant 0 : index
    %c0_22 = arith.constant 0 : index
    %29 = vector.load %arg5[%c0_21, %c0_22] : memref<2x128xf32, #tpu.memory_space<vmem>>, vector<1x128xf32>
    %30 = vector.broadcast %29 : vector<1x128xf32> to vector<8x128xf32>
    %31 = arith.mulf %30, %28 : vector<8x128xf32>
    %32 = arith.mulf %20, %31 : vector<8x128xf32>
    %c1_23 = arith.constant 1 : index
    %c0_24 = arith.constant 0 : index
    %33 = vector.load %arg5[%c1_23, %c0_24] : memref<2x128xf32, #tpu.memory_space<vmem>>, vector<1x128xf32>
    %34 = vector.broadcast %33 : vector<1x128xf32> to vector<8x128xf32>
    %35 = arith.addf %32, %34 : vector<8x128xf32>
    %cst_25 = arith.constant 0.000000e+00 : f32
    %36 = vector.broadcast %cst_25 : f32 to vector<8x128xf32>
    %37 = arith.cmpf oge, %35, %36 : vector<8x128xf32>
    %38 = vector.broadcast %8 : vector<8x1xf32> to vector<8x128xf32>
    %39 = arith.mulf %38, %35 : vector<8x128xf32>
    %40 = arith.select %37, %35, %39 : vector<8x128xi1>, vector<8x128xf32>
    %41 = vector.broadcast %6 : vector<8x1xf32> to vector<8x128xf32>
    %42 = arith.mulf %40, %41 : vector<8x128xf32>
    %43 = vector.broadcast %7 : vector<8x1xf32> to vector<8x128xf32>
    %44 = arith.addf %42, %43 : vector<8x128xf32>
    %45 = arith.negf %44 : vector<8x128xf32>
    %46 = math.exp %45 : vector<8x128xf32>
    %cst_26 = arith.constant 1.000000e+00 : f32
    %47 = vector.broadcast %cst_26 : f32 to vector<8x128xf32>
    %48 = arith.addf %47, %46 : vector<8x128xf32>
    %49 = arith.divf %47, %48 : vector<8x128xf32>
    %50 = arith.subf %1, %3 : vector<8x128xf32>
    %51 = arith.mulf %49, %50 : vector<8x128xf32>
    %52 = arith.addf %3, %51 : vector<8x128xf32>
    %c0_27 = arith.constant 0 : index
    %c0_28 = arith.constant 0 : index
    %c0_29 = arith.constant 0 : index
    %53 = vector.load %arg8[%c0_27, %c0_28, %c0_29] : memref<1x8x128xf32, #tpu.memory_space<vmem>>, vector<1x8x128xf32>
    %54 = vector.shape_cast %53 : vector<1x8x128xf32> to vector<8x128xf32>
    %55 = vector.shape_cast %52 : vector<8x128xf32> to vector<1x8x128xf32>
    tpu.vector_store %arg8[%c0_27, %c0_28, %c0_29], %55 {strides = array<i32>} : memref<1x8x128xf32, #tpu.memory_space<vmem>>, vector<1x8x128xf32>,
    return
  }
  func.func @transform_0(%arg0: i32, %arg1: i32) -> (i32, i32, i32) {
    %c0_i32 = arith.constant 0 : i32
    %c0_i32_0 = arith.constant 0 : i32
    return %arg0, %arg1, %c0_i32 : i32, i32, i32
  }
  func.func @transform_1(%arg0: i32, %arg1: i32) -> (i32, i32, i32) {
    %c0_i32 = arith.constant 0 : i32
    %c0_i32_0 = arith.constant 0 : i32
    return %arg0, %arg1, %c0_i32 : i32, i32, i32
  }
  func.func @transform_2(%arg0: i32, %arg1: i32) -> (i32, i32) {
    %c0_i32 = arith.constant 0 : i32
    %c0_i32_0 = arith.constant 0 : i32
    return %arg1, %c0_i32 : i32, i32
  }
  func.func @transform_3(%arg0: i32, %arg1: i32) -> (i32, i32) {
    %c0_i32 = arith.constant 0 : i32
    %c0_i32_0 = arith.constant 0 : i32
    %c0_i32_1 = arith.constant 0 : i32
    return %c0_i32, %c0_i32_0 : i32, i32
  }
  func.func @transform_4(%arg0: i32, %arg1: i32) -> (i32, i32) {
    %c0_i32 = arith.constant 0 : i32
    %c0_i32_0 = arith.constant 0 : i32
    %c0_i32_1 = arith.constant 0 : i32
    return %c0_i32, %c0_i32_0 : i32, i32
  }
  func.func @transform_5(%arg0: i32, %arg1: i32) -> (i32, i32) {
    %c0_i32 = arith.constant 0 : i32
    %c0_i32_0 = arith.constant 0 : i32
    %c0_i32_1 = arith.constant 0 : i32
    return %c0_i32, %c0_i32_0 : i32, i32
  }
  func.func @transform_6(%arg0: i32, %arg1: i32) -> (i32, i32, i32) {
    %c0_i32 = arith.constant 0 : i32
    %c0_i32_0 = arith.constant 0 : i32
    return %arg0, %arg1, %c0_i32 : i32, i32, i32
  }
}

</mosaic_0001>

<bundles_post_ra>
// kernel: tpu_custom_call.1
= control target key start
LH: loop header
LB: loop body
LE: loop exit
PB: predicated region body
PF: predicated region fallthrough
CT: control target
= control target key end

     0   :  { %11 = vsyncpa [#allocation3], 0  ;;  %s1401_s0 = inlined_call_operand.vmem [shape: f32[2,8,128], index: 0, kind: input, shape index: {}]   ;;  %s1402_s1 = inlined_call_operand.vmem [shape: f32[2,8,128], index: 1, kind: input, shape index: {}]   ;;  %s1403_s2 = inlined_call_operand.vmem [shape: f32[8,5], index: 2, kind: input, shape index: {}]   ;;  %s1404_s3 = inlined_call_operand.vmem [shape: f32[2,128], index: 3, kind: input, shape index: {}]   ;;  %s1405_s4 = inlined_call_operand.vmem [shape: f32[128,8], index: 4, kind: input, shape index: {}]   ;;  %s1406_s5 = inlined_call_operand.vmem [shape: f32[8,128], index: 5, kind: input, shape index: {}]   ;;  %s1407_s6 = inlined_call_operand.hbm [shape: f32[2,8,128], index: 6, kind: output, shape index: {}]  }
   0x1   :  { %13 = vsyncpa [#allocation3 + $0x1], 0  ;;  %s1180_s21 = smov 0   ;;  %s1182_s22 = smov 0  }
   0x2   :  { %s1184_s23 = smov 0   ;;  %s1186_s24 = smov 0  }
   0x3   :  { %s1188_s25 = smov 0   ;;  %s1190_s26 = smov 0  }
   0x4 LB: > { %s797_s27 = sadd.s32 4294967295, %s1134_s26   ;;  %s798_s28 = sadd.s32 4294967294, %s1134_s26   ;;  %s1134_s26 = sphi %s1190_s26, %s19_s26   ;;  %s1130_s25 = sphi %s1188_s25, %s1414_s25   ;;  %s1126_s24 = sphi %s1186_s24, %s1413_s24   ;;  %s1122_s23 = sphi %s1184_s23, %s1412_s23   ;;  %s1118_s22 = sphi %s1182_s22, %s1411_s22   ;;  %s1114_s21 = sphi %s1180_s21, %s1410_s21  }
   0x5   : > { %s31_s29 = sadd.s32 1, %s1130_s25  ;;  %s185_s30 = sadd.s32 1, %s1122_s23 }
   0x6   : > { %p33_p0 = scmp.ge.s32.totalorder %s31_s29, 2  ;;  %p195_p1 = scmp.ne.s32.totalorder %s1122_s23, %s1118_s22 }
   0x7   : > { %p196_p2 = scmp.eq.s32.totalorder %s797_s27, 1  ;;  %p201_p3 = scmp.ne.s32.totalorder %s1118_s22, %s1114_s21 }
   0x8   : > { %s1416_s29 = smov (%p33_p0, %s31_s29), 0  ;;  %p202_p5 = scmp.eq.s32.totalorder %s798_s28, 1 }
   0x9   : > { %p1220_p4 = por %p196_p2, %p195_p1  ;;  %s180_s8 = ssub.s32 %s1130_s25, %s1416_s29 }
   0xa   : > { %p802_p6 = scmp.ge.s32.totalorder %s1134_s26, 1  ;;  %p183_p7 = scmp.eq.s32.totalorder %s180_s8, 0 }
   0xb   : > { %p1227_p8 = por %p202_p5, %p201_p3  ;;  %p256_p9 = scmp.lt.s32.totalorder %s1134_s26, 3 }
   0xc   : > { %s1233_s10 = scalar_select %p183_p7, %s1122_s23, %s185_s30  }
   0xd   : > { %p257_p10 = pnand %p802_p6, %p256_p9 }
   0xe   : > { %v1238_v0 = vld [vmem:[%s1403_s2] sm:$0xff] (!%p257_p10)  ;;  %v333_v2 = vld [vmem:[%s1405_s4 + $0x8] sm:$0xff] (!%p257_p10)  ;;  %v1136_v3 = vmov (!%p257_p10), 0   ;;  %v1137_v4 = vmov (!%p257_p10), 0.0|0.0   ;;  %v334_v6 = vld [vmem:[%s1405_s4 + $0x10] sm:$0xff] (!%p257_p10)  ;;  %v1138_v11 = vmov (!%p257_p10), 1  }
   0xf   : > { %260 = sbr.rel (%p257_p10) target bundleno = 1077 (0x435), region = 44  ;;  %v332_v1 = vld [vmem:[%s1405_s4] sm:$0xff] (!%p257_p10)  ;;  %1044 = vset.pattern.permute.xlu0 (!%p257_p10), %v1136_v3  ;;  %933 = vmatprep.subr.bf16.mxu0 (!%p257_p10), %v1137_v4  ;;  %v335_v7 = vld [vmem:[%s1405_s4 + $0x18] sm:$0xff] (!%p257_p10)  ;;  %v337_v10 = vld [vmem:[%s1405_s4 + $0x28] sm:$0xff] (!%p257_p10)  ;;  %vm1139_vm0 = vmmov (!%p257_p10), 0   ;;  %v1140_v15 = vmov (!%p257_p10), 0.0  }
  0x10   : > { %v1247_v5 = vpack.c.bf16 (!%p257_p10), %v333_v2, %v332_v1  ;;  %323 = vperm.xlu0 (!%p257_p10), %1044, %v1238_v0   ;;  %v1257_v8 = vpack.c.bf16 (!%p257_p10), %v335_v7, %v334_v6  ;;  %v336_v9 = vld [vmem:[%s1405_s4 + $0x20] sm:$0xff] (!%p257_p10)  ;;  %v338_v13 = vld [vmem:[%s1405_s4 + $0x30] sm:$0xff] (!%p257_p10)  ;;  %v339_v14 = vld [vmem:[%s1405_s4 + $0x38] sm:$0xff] (!%p257_p10)  ;;  %885 = vmatprep.mubr.msk.f32.mxu0 (!%p257_p10), %vm1139_vm0, %v1140_v15  ;;  %p299_p11 = scmp.lt.s32.totalorder (!%p257_p10), %s1126_s24, 1  ;;  %vm420_vm1 = vcmask (!%p257_p10), 64512   ;;  %v1141_v44 = vmov (!%p257_p10), 4  }
  0x11   : > { %v940_v12 = vpack.c.bf16 (!%p257_p10), %v337_v10, %v336_v9  ;;  %888 = vmatprep.subr.mxu1 (!%p257_p10), %v1140_v15  ;;  %890 = vmatprep.mubr.msk.f32.mxu1 (!%p257_p10), %vm1139_vm0, %v1140_v15  ;;  %v943_v16 = vpack.c.bf16 (!%p257_p10), %v339_v14, %v338_v13  ;;  %v340_v17 = vld [vmem:[%s1405_s4 + $0x40] sm:$0xff] (!%p257_p10)  ;;  %v341_v18 = vld [vmem:[%s1405_s4 + $0x48] sm:$0xff] (!%p257_p10)  ;;  %v342_v20 = vld [vmem:[%s1405_s4 + $0x50] sm:$0xff] (!%p257_p10)  ;;  %v1142_v45 = vmov (!%p257_p10), 3   ;;  %v1143_v46 = vmov (!%p257_p10), 2   ;;  %s812_s19 = sshll.u32 (!%p257_p10), %s1126_s24, 7 }
  0x12   : > { %935 = vmatpush3.bf16.msra.mxu0 (!%p257_p10), %v1247_v5  ;;  %v946_v19 = vpack.c.bf16 (!%p257_p10), %v341_v18, %v340_v17  ;;  %v343_v21 = vld [vmem:[%s1405_s4 + $0x58] sm:$0xff] (!%p257_p10)  ;;  %v344_v23 = vld [vmem:[%s1405_s4 + $0x60] sm:$0xff] (!%p257_p10)  ;;  %v345_v24 = vld [vmem:[%s1405_s4 + $0x68] sm:$0xff] (!%p257_p10)  ;;  %1046 = vset.pattern.permute.xlu1 (!%p257_p10), %v1141_v44 }
  0x13   : > { %936 = vmatprep.subr.bf16.mxu0 (!%p257_p10), %v1137_v4  ;;  %v949_v22 = vpack.c.bf16 (!%p257_p10), %v343_v21, %v342_v20  ;;  %v952_v25 = vpack.c.bf16 (!%p257_p10), %v345_v24, %v344_v23  ;;  %v346_v26 = vld [vmem:[%s1405_s4 + $0x70] sm:$0xff] (!%p257_p10)  ;;  %v347_v27 = vld [vmem:[%s1405_s4 + $0x78] sm:$0xff] (!%p257_p10)  ;;  %v348_v36 = vld [vmem:[%s1406_s5] sm:$0xff] (!%p257_p10)  ;;  %656 = vperm.xlu1 (!%p257_p10), %1046, %v1238_v0  }
  0x14   : > { %1045 = vset.pattern.permute.xlu0 (!%p257_p10), %v1138_v11  ;;  %v955_v28 = vpack.c.bf16 (!%p257_p10), %v347_v27, %v346_v26  ;;  %889 = vmatpush3.msra.mxu1 (!%p257_p10), %v348_v36  ;;  %v808_v54 = vld [vmem:[%s1404_s3] ss:$0 sm:$0xff] (!%p257_p10)  ;;  %v809_v57 = vld [vmem:[%s1404_s3 + $0x1] ss:$0 sm:$0xff] (!%p257_p10) }
  0x15   : > { %328 = vperm.xlu0 (!%p257_p10), %1045, %v1238_v0   ;;  %957 = vmatprep.subr.bf16.mxu1 (!%p257_p10), %v1137_v4 }
  0x16   : > { %938 = vmatpush3.bf16.msra.mxu0 %v1257_v8  ;;  %s300_s17 = scalar_select %p299_p11, %s1126_s24, 1 }
  0x17   : > { %939 = vmatprep.subr.bf16.mxu0 %v1137_v4  ;;  %1047 = vset.pattern.permute.xlu1 %v1143_v46  ;;  %s1144_s24 = smov [#allocation2]  }
  0x18   : > { %s804_s18 = sshll.u32 %s300_s17, 3  ;;  %662 = vperm.xlu1 %1047, %v1238_v0   ;;  %s296_s17 = sand.u32 1, %s1118_s22  }
  0x19   : > { %s305_s27 = scalar_lea.vmem %s1401_s0, %s804_s18  ;;  %s312_s8 = scalar_lea.vmem %s1402_s1, %s804_s18  ;;  %1049 = vset.pattern.permute.xlu0 %v1142_v45 }
  0x1a   : > { %941 = vmatpush3.bf16.msra.mxu0 %v940_v12  ;;  %v1314_v29 = vld [vmem:[%s305_s27] sm:$0xff]  ;;  %s803_s18 = sshll.u32 %s296_s17, 3  ;;  %s682_s11 = scalar_lea.sflag [#allocation3], %s296_s17 }
  0x1b   : > { %942 = vmatprep.subr.bf16.mxu0 %v1137_v4  ;;  %v1316_v30 = vld [vmem:[%s312_s8] sm:$0xff]  ;;  %s298_s20 = scalar_lea.vmem [#allocation2], %s803_s18  ;;  %s1354_s8 = scalar_lea.hbm %s1407_s6, %s812_s19 }
  0x1c   : > { %v320_v32 = vadd.f32 %v1316_v30, %v1314_v29  ;;  %1048 = vset.pattern.permute.xlu1 %v1142_v45  ;;  %s696_s27 = sshll.u32 %s298_s20, 4  ;;  %s1060_s13 = sshll.u32 %s1144_s24, 4  ;;  %s1356_s27 = int_to_ptr.vmem [resolvable:$true] %s696_s27  ;;  %s1061_s13 = int_to_ptr.vmem [resolvable:$false] %s1060_s13 }
  0x1d   : > { %667 = vperm.xlu1 %1048, %v1238_v0   ;;  %s1056_s12 = scalar_lea.vmem %s1356_s27, 128  ;;  %s1062_s14 = scalar_lea.vmem %s1061_s13, 256 }
  0x1e   : > { %944 = vmatpush3.bf16.msra.mxu0 %v943_v16  ;;  %p1057_p12 = scmp.ne.s32.totalorder %s1356_s27, %s1056_s12  ;;  %p1063_p1 = scmp.lt.s32.totalorder %s1356_s27, %s1061_s13 }
  0x1f   : > { %945 = vmatprep.subr.bf16.mxu0 %v1137_v4  ;;  %p1064_p2 = scmp.lt.s32.totalorder %s1062_s14, %s1056_s12 }
  0x20   : > { %p1058_p13 = pnand %p1057_p12, %p1220_p4 }
  0x21   : > { %p1065_p3 = por %p1064_p2, %p1063_p1 }
  0x22   : > { %947 = vmatpush3.bf16.msra.mxu0 %v946_v19  ;;  %p1059_p0 = pneg %p1058_p13 }
  0x23   : > { %948 = vmatprep.subr.bf16.mxu0 %v1137_v4 }
  0x24   : > { %p1066_p5 = pnand %p1065_p3, %p1059_p0 }
  0x26   : > { %950 = vmatpush3.bf16.msra.mxu0 %v949_v22 }
  0x27   : > { %951 = vmatprep.subr.bf16.mxu0 %v1137_v4 }
  0x2a   : > { %953 = vmatpush3.bf16.msra.mxu0 %v952_v25 }
  0x2b   : > { %954 = vmatprep.subr.bf16.mxu0 %v1137_v4 }
  0x2e   : > { %956 = vmatpush3.bf16.msra.mxu0 %v955_v28 }
  0x2f   : > { %928 = vmatprep.subr.mxu0 %v1140_v15 }
  0x8f   : > { %v324_v31 = vpop.permute.xlu0 %323 }
  0x90   : > { %v326_v33 = vmul.f32 %v324_v31, %v320_v32 }
  0x92   : > { %v657_v53 = vpop.permute.xlu1 %656 }
  0x94   : > { %v329_v34 = vpop.permute.xlu0 %328 }
  0x95   : > { %v331_v35 = vadd.f32 %v329_v34, %v326_v33 }
  0x97   : > { %886 = vmatmul.mubr.f32.vlgmr.msra.gmra.mrb[0].mxu0 %v331_v35  ;;  %v663_v59 = vpop.permute.xlu1 %662 }
  0x98   : > { %930 = vmatprep.mubr.msk.f32.mxu0 %vm1139_vm0, %v1140_v15  ;;  %929 = vmatpush3.msra.mxu0 %v348_v36 }
  0x9c   : > { %v668_v63 = vpop.permute.xlu1 %667 }
 0x16a   : > { %v415_v37 = vpop.f32.mrb[0].mxu0 }
 0x16b   : > { %v419_v38 = vmul.f32 0.0625, %v415_v37  ;;  %v887_v39 = vpop.f32.mrb[1].mxu0 }
 0x16d   : > { %891 = vmatmul.mubr.msk.f32.vlgmr.msra.gmra.mrb[0].mxu1 %vm420_vm1, %v419_v38 }
 0x16e   : > { %959 = vmatpush3.bf16.msra.mxu1 %v1247_v5  ;;  %925 = vmatprep.mubr.msk.f32.mxu1 %vm1139_vm0, %v1140_v15  ;;  %v677_v5 = vsub.f32 %v1314_v29, %v1316_v30 }
 0x16f   : > { %960 = vmatprep.subr.bf16.mxu1 %v1137_v4 }
 0x172   : > { %962 = vmatpush3.bf16.msra.mxu1 %v1257_v8 }
 0x173   : > { %963 = vmatprep.subr.bf16.mxu1 %v1137_v4 }
 0x176   : > { %965 = vmatpush3.bf16.msra.mxu1 %v940_v12 }
 0x177   : > { %966 = vmatprep.subr.bf16.mxu1 %v1137_v4 }
 0x17a   : > { %968 = vmatpush3.bf16.msra.mxu1 %v943_v16 }
 0x17b   : > { %969 = vmatprep.subr.bf16.mxu1 %v1137_v4 }
 0x17e   : > { %971 = vmatpush3.bf16.msra.mxu1 %v946_v19 }
 0x17f   : > { %972 = vmatprep.subr.bf16.mxu1 %v1137_v4 }
 0x182   : > { %974 = vmatpush3.bf16.msra.mxu1 %v949_v22 }
 0x183   : > { %975 = vmatprep.subr.bf16.mxu1 %v1137_v4 }
 0x186   : > { %977 = vmatpush3.bf16.msra.mxu1 %v952_v25 }
 0x187   : > { %978 = vmatprep.subr.bf16.mxu1 %v1137_v4 }
 0x18a   : > { %980 = vmatpush3.bf16.msra.mxu1 %v955_v28 }
 0x240   : > { %v490_v40 = vpop.f32.mrb[0].mxu1 }
 0x241   : > { %v494_v41 = vsub.f32 %v331_v35, %v490_v40  ;;  %v892_v42 = vpop.f32.mrb[1].mxu1 }
 0x243   : > { %v495_v43 = vmul.f32 %v494_v41, %v494_v41 }
 0x245   : > { %926 = vmatmul.mubr.f32.vlgmr.msra.gmra.mrb[2].mxu1 %v495_v43 }
 0x318   : > { %v562_v47 = vpop.f32.mrb[2].mxu1 }
 0x319   : > { %v566_v48 = vmul.f32 0.0625, %v562_v47  ;;  %v927_v49 = vpop.f32.mrb[3].mxu1 }
 0x31b   : > { %931 = vmatmul.mubr.msk.f32.vlgmr.msra.gmra.mrb[2].mxu0 %vm420_vm1, %v566_v48 }
 0x3ee   : > { %v636_v50 = vpop.f32.mrb[2].mxu0 }
 0x3ef   : > { %v637_v51 = vadd.f32 4.0, %v636_v50  ;;  %v932_v52 = vpop.f32.mrb[3].mxu0 }
 0x3f1   : > { %1050 = vrsqrt.f32 %v637_v51 }
 0x3fb   : > { %v1051_v55 = vpop.eup %1050 }
 0x3fc   : > { %v646_v56 = vmul.f32 %v1051_v55, %v808_v54 }
 0x3fe   : > { %v647_v58 = vmul.f32 %v646_v56, %v494_v41 }
 0x400   : > { %v653_v60 = vadd.f32 %v809_v57, %v647_v58 }
 0x402   : > { %v659_v61 = vmul.f32 %v657_v53, %v653_v60  ;;  %vm654_vm2 = vcmp.ge.f32.partialorder %v653_v60, 0.0 }
 0x404   : > { %v660_v62 = vsel %vm654_vm2, %v653_v60, %v659_v61 }
 0x405   : > { %v665_v0 = vmul.f32 %v663_v59, %v660_v62 }
 0x407   : > { %v670_v1 = vadd.f32 %v668_v63, %v665_v0 }
 0x409   : > { %v810_v2 = vmul.f32 -1.442695, %v670_v1 }
 0x40b   : > { %1052 = vpow2.f32 %v810_v2 }
 0x415   : > { %v1053_v3 = vpop.eup %1052 }
 0x416   : > { %v674_v4 = vadd.f32 1.0, %v1053_v3 }
 0x418   : > { %1054 = vrcp.f32 %v674_v4 }
 0x422   : > { %v1055_v6 = vpop.eup %1054 }
 0x423   : > { %v678_v7 = vmul.f32 %v1055_v6, %v677_v5 }
 0x425   : > { %v679_v8 = vadd.f32 %v678_v7, %v1316_v30 }
 0x427   : > { %680 = vst [vmem:[%s298_s20] sm:$0xff] %v679_v8 }
 0x428   : > { %1069 = shalt.err (!%p1066_p5)
}
 0x429   : > { %s1070_s15 = scalar_lea.hbm %s1354_s8, 128  ;;  %s1074_s18 = scalar_lea.hbm %s1407_s6, 256 }
 0x42a   : > { %p1071_p6 = scmp.ne.s32.totalorder %s1354_s8, %s1070_s15  ;;  %p1075_p10 = scmp.lt.u32.totalorder %s1354_s8, %s1407_s6 }
 0x42b   : > { %p1076_p11 = scmp.lt.u32.totalorder %s1074_s18, %s1070_s15  ;;  %p1078_p13 = scmp.lt.u32.totalorder %s1070_s15, %s1354_s8 }
 0x42c   : > { %p1072_p7 = pnand %p1071_p6, %p1220_p4 }
 0x42d   : > { %p1077_p12 = por %p1076_p11, %p1075_p10 }
 0x42e   : > { %p1073_p9 = pneg %p1072_p7 }
 0x42f   : > { %p1079_p0 = por %p1078_p13, %p1077_p12 }
 0x431   : > { %p1080_p1 = pnand %p1079_p0, %p1073_p9 }
 0x433   : > { %1083 = shalt.err (!%p1080_p1)
}
 0x434   : > { %981 = dma.vmem_to_hbm [thread:$0]  (%p1220_p4), %s1356_s27, 128, %s1354_s8, %s682_s11  }
 0x435 PF: > { %p987_p2 = scmp.ge.s32.totalorder %s1134_s26, 2  ;;  %s708_s28 = sand.u32 1, %s1114_s21  }
 0x436   : > { %s709_s30 = scalar_lea.sflag [#allocation3], %s708_s28 }
 0x437   : > { %p984_p3 = pnand %p987_p2, %p1227_p8 }
 0x439   : > { %1109 = dma.done.wait (!%p984_p3), %s709_s30, 128  }
 0x43a   : > { %1111 = vsyncadd (!%p984_p3), %s709_s30, 4294967168  ;;  %s19_s26 = sadd.s32 1, %s1134_s26   ;;  %s1410_s21 = smov %s1118_s22 }
 0x43b   : > { %p16_p5 = scmp.ge.s32.totalorder %s19_s26, 4   ;;  %s1411_s22 = smov %s1122_s23 }
 0x43c   : > { %s1412_s23 = smov %s1233_s10  ;;  %s1413_s24 = smov %s1130_s25 }
 0x43d   : > { %s1414_s25 = smov %s1416_s29  ;;  %18 = sbr.rel (!%p16_p5) target bundleno = 4 (0x4), region = 85 }
 0x444   :  { %714 = vsyncpa [#allocation3], 1 }
 0x445   :  { %716 = vsyncpa [#allocation3 + $0x1], 1 }

</bundles_post_ra>
